<compile_context>
chip_gen: v7x
topology: tpu7x:2x2x1
jax: 0.10.0
libtpu: 0.0.40
codegen_flags: <defaults>
</compile_context>

<pallas_src>
import jax
import jax.numpy as jnp
from jax.experimental import pallas as pl
from jax.experimental.pallas import tpu as pltpu

H1 = 512   # first hidden width
H2 = 128   # hdim


def _round_up(n, m):
    return ((n + m - 1) // m) * m


def qnetwork_kernel(x_ref,
                    w1_ref, b1_ref,
                    w2a_ref, b2a_ref, w2b_ref, b2b_ref,
                    w3a_ref, w3b_ref, b3_ref,
                    y_ref):
    f32 = jnp.float32
    bf16 = jnp.bfloat16

    x = x_ref[...]                                              # (tb, state_dim) bf16

    # Fused layer 1 for both heads: x @ concat(w1a, w1b) -> (tb, 2*H1).
    h1 = jnp.dot(x, w1_ref[...], preferred_element_type=f32) + b1_ref[...]
    h1 = jnp.maximum(h1, 0.0).astype(bf16)
    h1a = h1[:, :H1]
    h1b = h1[:, H1:]

    # Per-head layer 2 (block-diagonal fusion here would double the MACs).
    h2a = jnp.maximum(
        jnp.dot(h1a, w2a_ref[...], preferred_element_type=f32) + b2a_ref[...],
        0.0).astype(bf16)
    h2b = jnp.maximum(
        jnp.dot(h1b, w2b_ref[...], preferred_element_type=f32) + b2b_ref[...],
        0.0).astype(bf16)

    # Layer 3: both heads write disjoint lanes of a single lane-dense output tile
    # (w3a_p / w3b_p are zero outside their own column range).
    y = (jnp.dot(h2a, w3a_ref[...], preferred_element_type=f32)
         + jnp.dot(h2b, w3b_ref[...], preferred_element_type=f32)
         + b3_ref[...])
    y_ref[...] = y.astype(y_ref.dtype)


def prepare_qnetwork_params(params1, params2):
    """One-time parameter prep (bf16 cast, layer-1 concat, layer-3 lane packing).

    params{1,2} = (w1, b1, w2, b2, w3, b3); weights pre-transposed to
    (in_features, out_features), biases 1-D.  Call once, reuse every forward.
    """
    w1a, b1a, w2a, b2a, w3a, b3a = params1
    w1b, b1b, w2b, b2b, w3b, b3b = params2
    action_dim = w3a.shape[1]
    dout_p = _round_up(2 * action_dim, 128)
    bf16, f32 = jnp.bfloat16, jnp.float32

    w1f = jnp.concatenate([w1a, w1b], axis=1).astype(bf16)            # (sd, 2*H1)
    b1f = jnp.concatenate([b1a, b1b]).reshape(1, -1).astype(f32)      # (1, 2*H1)

    w3a_p = jnp.zeros((H2, dout_p), bf16).at[:, :action_dim].set(w3a.astype(bf16))
    w3b_p = jnp.zeros((H2, dout_p), bf16).at[:, action_dim:2 * action_dim].set(
        w3b.astype(bf16))
    b3f = (jnp.zeros((1, dout_p), f32)
           .at[0, :action_dim].set(b3a.astype(f32))
           .at[0, action_dim:2 * action_dim].set(b3b.astype(f32)))

    arrays = (w1f, b1f,
              w2a.astype(bf16), b2a.reshape(1, -1).astype(f32),
              w2b.astype(bf16), b2b.reshape(1, -1).astype(f32),
              w3a_p, w3b_p, b3f)
    return arrays, action_dim


def qnetwork_forward(x, prepped, *, tile_b=1024):
    """Returns (x1, x2) = (fc1(x), fc2(x)) given prepare_qnetwork_params output."""
    arrays, action_dim = prepped
    (w1f, b1f, w2a, b2a, w2b, b2b, w3a_p, w3b_p, b3f) = arrays
    B, state_dim = x.shape
    dout_p = w3a_p.shape[1]
    f32 = jnp.float32

    # No batch padding: ragged last tile handled by Pallas partial blocks
    # (row-independent math; OOB rows never written back).  Ensure >= 2 tiles
    # when possible so the "parallel" axis spans both v7x TensorCores.
    if B <= tile_b:
        tile_b = max(8, _round_up(pl.cdiv(B, 2), 8))
    else:
        tile_b = _round_up(tile_b, 8)
    grid = (pl.cdiv(B, tile_b),)

    x_bf = x.astype(jnp.bfloat16)

    # Constant-index (VMEM-resident) weight/bias blocks.
    # TODO(synk): pipeline_mode=pl.Buffered(1) on these would save ~0.4 MiB of
    # double-buffer VMEM; omitted to keep compilation conservative.
    def resident(arr):
        return pl.BlockSpec(arr.shape, lambda i: (0, 0))

    flops = 4 * B * (state_dim * H1 + H1 * H2 + H2 * dout_p)
    bytes_accessed = (2 * B * state_dim                       # x (bf16)
                      + 4 * B * dout_p                        # fused output (f32)
                      + 2 * (state_dim * 2 * H1 + 2 * H1 * H2 + 2 * H2 * dout_p)
                      + 4 * (2 * H1 + 2 * H2 + dout_p))

    y = pl.pallas_call(
        qnetwork_kernel,
        out_shape=jax.ShapeDtypeStruct((B, dout_p), f32),
        grid_spec=pltpu.PrefetchScalarGridSpec(
            num_scalar_prefetch=0,
            grid=grid,
            in_specs=[pl.BlockSpec((tile_b, state_dim), lambda i: (i, 0)),
                      resident(w1f), resident(b1f),
                      resident(w2a), resident(b2a),
                      resident(w2b), resident(b2b),
                      resident(w3a_p), resident(w3b_p), resident(b3f)],
            out_specs=pl.BlockSpec((tile_b, dout_p), lambda i: (i, 0)),
        ),
        compiler_params=pltpu.CompilerParams(
            dimension_semantics=("parallel",),
            vmem_limit_bytes=32 * 1024 * 1024,
        ),
        cost_estimate=pl.CostEstimate(
            flops=flops, transcendentals=0, bytes_accessed=bytes_accessed),
    )(x_bf, w1f, b1f, w2a, b2a, w2b, b2b, w3a_p, w3b_p, b3f)

    return y[:, :action_dim], y[:, action_dim:2 * action_dim]


def reference_forward(x, params1, params2):
    def head(p):
        w1, b1, w2, b2, w3, b3 = p
        h = jnp.maximum(x @ w1 + b1, 0.0)
        h = jnp.maximum(h @ w2 + b2, 0.0)
        return h @ w3 + b3
    return head(params1), head(params2)


def reference_forward_bf16(x, params1, params2):
    """Emulates the kernel's bf16-input / f32-accumulate numerics."""
    bf16, f32 = jnp.bfloat16, jnp.float32

    def head(p):
        w1, b1, w2, b2, w3, b3 = p
        h = jnp.dot(x.astype(bf16), w1.astype(bf16), preferred_element_type=f32) + b1
        h = jnp.maximum(h, 0.0).astype(bf16)
        h = jnp.dot(h, w2.astype(bf16), preferred_element_type=f32) + b2
        h = jnp.maximum(h, 0.0).astype(bf16)
        return jnp.dot(h, w3.astype(bf16), preferred_element_type=f32) + b3
    return head(params1), head(params2)


if __name__ == "__main__":
    # Small shapes consistent with the module: batch=6 (exercises the ragged
    # partial tile), state_dim=32, action_dim=8; hidden widths fixed at 512, 128.
    B, state_dim, action_dim = 6, 32, 8

    key = jax.random.PRNGKey(0)
    keys = jax.random.split(key, 13)
    x = jax.random.normal(keys[0], (B, state_dim), dtype=jnp.float32)

    def xavier(k, fan_in, fan_out):
        # xavier_uniform_ (gain=1), stored pre-transposed as (in, out).
        bound = float(jnp.sqrt(6.0 / (fan_in + fan_out)))
        return jax.random.uniform(k, (fan_in, fan_out), jnp.float32, -bound, bound)

    def make_head(wk, bk):
        # Note: the PyTorch module initializes biases to 0; small non-zero
        # biases are used here purely to exercise the bias-add path.
        w1 = xavier(wk[0], state_dim, H1)
        w2 = xavier(wk[1], H1, H2)
        w3 = xavier(wk[2], H2, action_dim)
        b1 = 0.01 * jax.random.normal(bk[0], (H1,), jnp.float32)
        b2 = 0.01 * jax.random.normal(bk[1], (H2,), jnp.float32)
        b3 = 0.01 * jax.random.normal(bk[2], (action_dim,), jnp.float32)
        return (w1, b1, w2, b2, w3, b3)

    params1 = make_head(keys[1:4], keys[4:7])
    params2 = make_head(keys[7:10], keys[10:13])

    prepped = prepare_qnetwork_params(params1, params2)   # one-time prep
    y1, y2 = qnetwork_forward(x, prepped)
    y1 = jax.block_until_ready(y1)
    y2 = jax.block_until_ready(y2)

    # Tight check against a bf16-with-f32-accumulate emulation of the kernel.
    e1, e2 = reference_forward_bf16(x, params1, params2)
    assert jnp.allclose(y1, e1, atol=2e-3, rtol=2e-3), "fc1 head mismatch (bf16 ref)"
    assert jnp.allclose(y2, e2, atol=2e-3, rtol=2e-3), "fc2 head mismatch (bf16 ref)"

    # Loose check against the true f32 forward (bf16 quantization error only).
    r1, r2 = reference_forward(x, params1, params2)
    assert jnp.allclose(y1, r1, atol=5e-2, rtol=5e-2), "fc1 head mismatch (f32 ref)"
    assert jnp.allclose(y2, r2, atol=5e-2, rtol=5e-2), "fc2 head mismatch (f32 ref)"

    print("KERNEL_OK")
</pallas_src>

<mosaic_0001>
module attributes {stable_mosaic.version = 11 : i64} {
  func.func @qnetwork_kernel(%arg0: i32, %arg1: memref<8x32xbf16, #tpu.memory_space<vmem>>, %arg2: memref<32x1024xbf16, #tpu.memory_space<vmem>>, %arg3: memref<1x1024xf32, #tpu.memory_space<vmem>>, %arg4: memref<512x128xbf16, #tpu.memory_space<vmem>>, %arg5: memref<1x128xf32, #tpu.memory_space<vmem>>, %arg6: memref<512x128xbf16, #tpu.memory_space<vmem>>, %arg7: memref<1x128xf32, #tpu.memory_space<vmem>>, %arg8: memref<128x128xbf16, #tpu.memory_space<vmem>>, %arg9: memref<128x128xbf16, #tpu.memory_space<vmem>>, %arg10: memref<1x128xf32, #tpu.memory_space<vmem>>, %arg11: memref<8x128xf32, #tpu.memory_space<vmem>>) attributes {dimension_semantics = [#tpu.dimension_semantics<parallel>], iteration_bounds = array<i64: 1>, scalar_prefetch = 0 : i64, scratch_operands = 0 : i64, tpu.core_type = #tpu.core_type<tc>, window_params = [{transform_indices = @transform_0, window_bounds = array<i64: 8, 32>}, {pipeline_mode = #tpu.pipeline_mode<synchronous>, transform_indices = @transform_1, window_bounds = array<i64: 32, 1024>}, {pipeline_mode = #tpu.pipeline_mode<synchronous>, transform_indices = @transform_2, window_bounds = array<i64: 1, 1024>}, {pipeline_mode = #tpu.pipeline_mode<synchronous>, transform_indices = @transform_3, window_bounds = array<i64: 512, 128>}, {pipeline_mode = #tpu.pipeline_mode<synchronous>, transform_indices = @transform_4, window_bounds = array<i64: 1, 128>}, {pipeline_mode = #tpu.pipeline_mode<synchronous>, transform_indices = @transform_5, window_bounds = array<i64: 512, 128>}, {pipeline_mode = #tpu.pipeline_mode<synchronous>, transform_indices = @transform_6, window_bounds = array<i64: 1, 128>}, {pipeline_mode = #tpu.pipeline_mode<synchronous>, transform_indices = @transform_7, window_bounds = array<i64: 128, 128>}, {pipeline_mode = #tpu.pipeline_mode<synchronous>, transform_indices = @transform_8, window_bounds = array<i64: 128, 128>}, {pipeline_mode = #tpu.pipeline_mode<synchronous>, transform_indices = @transform_9, window_bounds = array<i64: 1, 128>}, {transform_indices = @transform_10, window_bounds = array<i64: 8, 128>}]} {
    %c0 = arith.constant 0 : index
    %c0_0 = arith.constant 0 : index
    %0 = vector.load %arg1[%c0, %c0_0] : memref<8x32xbf16, #tpu.memory_space<vmem>>, vector<8x32xbf16>
    %c0_1 = arith.constant 0 : index
    %c0_2 = arith.constant 0 : index
    %1 = vector.load %arg2[%c0_1, %c0_2] : memref<32x1024xbf16, #tpu.memory_space<vmem>>, vector<32x1024xbf16>
    %cst = arith.constant dense<0.000000e+00> : vector<8x1024xf32>
    %2 = tpu.matmul %0, %1, %cst {dimension_numbers = #tpu.dot_dimension_numbers<[1], [0], [0], [1], [0, 0, 1, 1], [], []>} : vector<8x32xbf16>, vector<32x1024xbf16>, vector<8x1024xf32> -> vector<8x1024xf32>
    %c0_3 = arith.constant 0 : index
    %c0_4 = arith.constant 0 : index
    %3 = vector.load %arg3[%c0_3, %c0_4] : memref<1x1024xf32, #tpu.memory_space<vmem>>, vector<1x1024xf32>
    %4 = vector.broadcast %3 : vector<1x1024xf32> to vector<8x1024xf32>
    %5 = arith.addf %2, %4 : vector<8x1024xf32>
    %cst_5 = arith.constant 0.000000e+00 : f32
    %6 = vector.broadcast %cst_5 : f32 to vector<8x1024xf32>
    %7 = arith.maximumf %5, %6 : vector<8x1024xf32>
    %8 = arith.truncf %7 : vector<8x1024xf32> to vector<8x1024xbf16>
    %9 = vector.extract_strided_slice %8 {offsets = [0, 0], sizes = [8, 512], strides = [1, 1]} : vector<8x1024xbf16> to vector<8x512xbf16>
    %10 = vector.extract_strided_slice %8 {offsets = [0, 512], sizes = [8, 512], strides = [1, 1]} : vector<8x1024xbf16> to vector<8x512xbf16>
    %c0_6 = arith.constant 0 : index
    %c0_7 = arith.constant 0 : index
    %11 = vector.load %arg4[%c0_6, %c0_7] : memref<512x128xbf16, #tpu.memory_space<vmem>>, vector<512x128xbf16>
    %cst_8 = arith.constant dense<0.000000e+00> : vector<8x128xf32>
    %12 = tpu.matmul %9, %11, %cst_8 {dimension_numbers = #tpu.dot_dimension_numbers<[1], [0], [0], [1], [0, 0, 1, 1], [], []>} : vector<8x512xbf16>, vector<512x128xbf16>, vector<8x128xf32> -> vector<8x128xf32>
    %c0_9 = arith.constant 0 : index
    %c0_10 = arith.constant 0 : index
    %13 = vector.load %arg5[%c0_9, %c0_10] : memref<1x128xf32, #tpu.memory_space<vmem>>, vector<1x128xf32>
    %14 = vector.broadcast %13 : vector<1x128xf32> to vector<8x128xf32>
    %15 = arith.addf %12, %14 : vector<8x128xf32>
    %cst_11 = arith.constant 0.000000e+00 : f32
    %16 = vector.broadcast %cst_11 : f32 to vector<8x128xf32>
    %17 = arith.maximumf %15, %16 : vector<8x128xf32>
    %18 = arith.truncf %17 : vector<8x128xf32> to vector<8x128xbf16>
    %c0_12 = arith.constant 0 : index
    %c0_13 = arith.constant 0 : index
    %19 = vector.load %arg6[%c0_12, %c0_13] : memref<512x128xbf16, #tpu.memory_space<vmem>>, vector<512x128xbf16>
    %cst_14 = arith.constant dense<0.000000e+00> : vector<8x128xf32>
    %20 = tpu.matmul %10, %19, %cst_14 {dimension_numbers = #tpu.dot_dimension_numbers<[1], [0], [0], [1], [0, 0, 1, 1], [], []>} : vector<8x512xbf16>, vector<512x128xbf16>, vector<8x128xf32> -> vector<8x128xf32>
    %c0_15 = arith.constant 0 : index
    %c0_16 = arith.constant 0 : index
    %21 = vector.load %arg7[%c0_15, %c0_16] : memref<1x128xf32, #tpu.memory_space<vmem>>, vector<1x128xf32>
    %22 = vector.broadcast %21 : vector<1x128xf32> to vector<8x128xf32>
    %23 = arith.addf %20, %22 : vector<8x128xf32>
    %cst_17 = arith.constant 0.000000e+00 : f32
    %24 = vector.broadcast %cst_17 : f32 to vector<8x128xf32>
    %25 = arith.maximumf %23, %24 : vector<8x128xf32>
    %26 = arith.truncf %25 : vector<8x128xf32> to vector<8x128xbf16>
    %c0_18 = arith.constant 0 : index
    %c0_19 = arith.constant 0 : index
    %27 = vector.load %arg8[%c0_18, %c0_19] : memref<128x128xbf16, #tpu.memory_space<vmem>>, vector<128x128xbf16>
    %cst_20 = arith.constant dense<0.000000e+00> : vector<8x128xf32>
    %28 = tpu.matmul %18, %27, %cst_20 {dimension_numbers = #tpu.dot_dimension_numbers<[1], [0], [0], [1], [0, 0, 1, 1], [], []>} : vector<8x128xbf16>, vector<128x128xbf16>, vector<8x128xf32> -> vector<8x128xf32>
    %c0_21 = arith.constant 0 : index
    %c0_22 = arith.constant 0 : index
    %29 = vector.load %arg9[%c0_21, %c0_22] : memref<128x128xbf16, #tpu.memory_space<vmem>>, vector<128x128xbf16>
    %cst_23 = arith.constant dense<0.000000e+00> : vector<8x128xf32>
    %30 = tpu.matmul %26, %29, %cst_23 {dimension_numbers = #tpu.dot_dimension_numbers<[1], [0], [0], [1], [0, 0, 1, 1], [], []>} : vector<8x128xbf16>, vector<128x128xbf16>, vector<8x128xf32> -> vector<8x128xf32>
    %31 = arith.addf %28, %30 : vector<8x128xf32>
    %c0_24 = arith.constant 0 : index
    %c0_25 = arith.constant 0 : index
    %32 = vector.load %arg10[%c0_24, %c0_25] : memref<1x128xf32, #tpu.memory_space<vmem>>, vector<1x128xf32>
    %33 = vector.broadcast %32 : vector<1x128xf32> to vector<8x128xf32>
    %34 = arith.addf %31, %33 : vector<8x128xf32>
    %c0_26 = arith.constant 0 : index
    %c0_27 = arith.constant 0 : index
    %35 = vector.load %arg11[%c0_26, %c0_27] : memref<8x128xf32, #tpu.memory_space<vmem>>, vector<8x128xf32>
    tpu.vector_store %arg11[%c0_26, %c0_27], %34 {strides = array<i32>} : memref<8x128xf32, #tpu.memory_space<vmem>>, vector<8x128xf32>,
    return
  }
  func.func @transform_0(%arg0: i32) -> (i32, i32) {
    %c0_i32 = arith.constant 0 : i32
    %c0_i32_0 = arith.constant 0 : i32
    return %arg0, %c0_i32 : i32, i32
  }
  func.func @transform_1(%arg0: i32) -> (i32, i32) {
    %c0_i32 = arith.constant 0 : i32
    %c0_i32_0 = arith.constant 0 : i32
    %c0_i32_1 = arith.constant 0 : i32
    return %c0_i32, %c0_i32_0 : i32, i32
  }
  func.func @transform_2(%arg0: i32) -> (i32, i32) {
    %c0_i32 = arith.constant 0 : i32
    %c0_i32_0 = arith.constant 0 : i32
    %c0_i32_1 = arith.constant 0 : i32
    return %c0_i32, %c0_i32_0 : i32, i32
  }
  func.func @transform_3(%arg0: i32) -> (i32, i32) {
    %c0_i32 = arith.constant 0 : i32
    %c0_i32_0 = arith.constant 0 : i32
    %c0_i32_1 = arith.constant 0 : i32
    return %c0_i32, %c0_i32_0 : i32, i32
  }
  func.func @transform_4(%arg0: i32) -> (i32, i32) {
    %c0_i32 = arith.constant 0 : i32
    %c0_i32_0 = arith.constant 0 : i32
    %c0_i32_1 = arith.constant 0 : i32
    return %c0_i32, %c0_i32_0 : i32, i32
  }
  func.func @transform_5(%arg0: i32) -> (i32, i32) {
    %c0_i32 = arith.constant 0 : i32
    %c0_i32_0 = arith.constant 0 : i32
    %c0_i32_1 = arith.constant 0 : i32
    return %c0_i32, %c0_i32_0 : i32, i32
  }
  func.func @transform_6(%arg0: i32) -> (i32, i32) {
    %c0_i32 = arith.constant 0 : i32
    %c0_i32_0 = arith.constant 0 : i32
    %c0_i32_1 = arith.constant 0 : i32
    return %c0_i32, %c0_i32_0 : i32, i32
  }
  func.func @transform_7(%arg0: i32) -> (i32, i32) {
    %c0_i32 = arith.constant 0 : i32
    %c0_i32_0 = arith.constant 0 : i32
    %c0_i32_1 = arith.constant 0 : i32
    return %c0_i32, %c0_i32_0 : i32, i32
  }
  func.func @transform_8(%arg0: i32) -> (i32, i32) {
    %c0_i32 = arith.constant 0 : i32
    %c0_i32_0 = arith.constant 0 : i32
    %c0_i32_1 = arith.constant 0 : i32
    return %c0_i32, %c0_i32_0 : i32, i32
  }
  func.func @transform_9(%arg0: i32) -> (i32, i32) {
    %c0_i32 = arith.constant 0 : i32
    %c0_i32_0 = arith.constant 0 : i32
    %c0_i32_1 = arith.constant 0 : i32
    return %c0_i32, %c0_i32_0 : i32, i32
  }
  func.func @transform_10(%arg0: i32) -> (i32, i32) {
    %c0_i32 = arith.constant 0 : i32
    %c0_i32_0 = arith.constant 0 : i32
    return %arg0, %c0_i32 : i32, i32
  }
}

</mosaic_0001>

<bundles_post_ra>
// kernel: tpu_custom_call.1
= control target key start
LH: loop header
LB: loop body
LE: loop exit
PB: predicated region body
PF: predicated region fallthrough
CT: control target
= control target key end

     0   :  { %15 = vsyncpa [#allocation3], 0  ;;  %s2127_s0 = inlined_call_operand.hbm [shape: bf16[6,32], index: 0, kind: input, shape index: {}]   ;;  %s2128_s1 = inlined_call_operand.hbm [shape: bf16[32,1024], index: 1, kind: input, shape index: {}]   ;;  %s2129_s2 = inlined_call_operand.hbm [shape: f32[1,1024], index: 2, kind: input, shape index: {}]   ;;  %s2130_s3 = inlined_call_operand.hbm [shape: bf16[512,128], index: 3, kind: input, shape index: {}]   ;;  %s2131_s4 = inlined_call_operand.vmem [shape: f32[1,128], index: 4, kind: input, shape index: {}]   ;;  %s2132_s5 = inlined_call_operand.hbm [shape: bf16[512,128], index: 5, kind: input, shape index: {}]   ;;  %s2133_s6 = inlined_call_operand.vmem [shape: f32[1,128], index: 6, kind: input, shape index: {}]   ;;  %s2134_s7 = inlined_call_operand.hbm [shape: bf16[128,128], index: 7, kind: input, shape index: {}]   ;;  %s2135_s8 = inlined_call_operand.hbm [shape: bf16[128,128], index: 8, kind: input, shape index: {}]   ;;  %s2136_s9 = inlined_call_operand.vmem [shape: f32[1,128], index: 9, kind: input, shape index: {}]   ;;  %s2137_s10 = inlined_call_operand.hbm [shape: f32[6,128], index: 10, kind: output, shape index: {}]  }
   0x1   :  { %16 = vsyncpa [#allocation6], 0 }
   0x2   :  { %17 = vsyncpa [#allocation9], 0 }
   0x3   :  { %18 = vsyncpa [#allocation12], 0 }
   0x4   :  { %19 = vsyncpa [#allocation4], 0  ;;  %s1906_s13 = smov [#allocation5]   ;;  %s1720_s17 = scalar_lea.hbm %s2128_s1, 2048 }
   0x5   :  { %s35_s14 = sshll.u32 %s1906_s13, 4  ;;  %p1721_p0 = scmp.ne.s32.totalorder %s2128_s1, %s1720_s17  ;;  %s36_s14 = int_to_ptr.vmem [resolvable:$true] %s35_s14 }
   0x6   :  { %p1724_p1 = scmp.lt.u32.totalorder %s1720_s17, %s2128_s1 }
   0x8   :  { %p1726_p2 = pnand %p1724_p1, %p1721_p0 }
   0xa   :  { %1729 = shalt.err (!%p1726_p2)
}
   0xb   :  { %s1730_s22 = scalar_lea.vmem %s36_s14, 2048  ;;  %p1735_p4 = scmp.lt.s32.totalorder %s36_s14, %s36_s14 }
   0xc   :  { %p1731_p3 = scmp.ne.s32.totalorder %s36_s14, %s1730_s22  ;;  %p1736_p5 = scmp.lt.s32.totalorder %s1730_s22, %s1730_s22 }
   0xe   :  { %p1737_p6 = por %p1736_p5, %p1735_p4 }
  0x10   :  { %p1738_p7 = pnand %p1737_p6, %p1731_p3 }
  0x12   :  { %1741 = shalt.err (!%p1738_p7)
}
  0x13   :  { %s1907_s23 = smov 512   ;;  %s1908_s24 = smov 32  }
  0x14   :  { %41 = dma.hbm_to_vmem [thread:$0]  %s2128_s1, 2048, %s36_s14, [#allocation6], %s1907_s23, %s1907_s23, %s1908_s24  }
  0x15   :  { %s1909_s27 = smov [#allocation8]   ;;  %s1742_s11 = scalar_lea.hbm %s2130_s3, 4096 }
  0x16   :  { %s57_s28 = sshll.u32 %s1909_s27, 4  ;;  %p1743_p8 = scmp.ne.s32.totalorder %s2130_s3, %s1742_s11  ;;  %s58_s28 = int_to_ptr.vmem [resolvable:$true] %s57_s28 }
  0x17   :  { %p1746_p9 = scmp.lt.u32.totalorder %s1742_s11, %s2130_s3 }
  0x19   :  { %p1748_p10 = pnand %p1746_p9, %p1743_p8 }
  0x1b   :  { %1751 = shalt.err (!%p1748_p10)
}
  0x1c   :  { %s1752_s17 = scalar_lea.vmem %s58_s28, 4096  ;;  %p1757_p12 = scmp.lt.s32.totalorder %s58_s28, %s58_s28 }
  0x1d   :  { %p1753_p11 = scmp.ne.s32.totalorder %s58_s28, %s1752_s17  ;;  %p1758_p13 = scmp.lt.s32.totalorder %s1752_s17, %s1752_s17 }
  0x1f   :  { %p1759_p0 = por %p1758_p13, %p1757_p12 }
  0x21   :  { %p1760_p1 = pnand %p1759_p0, %p1753_p11 }
  0x23   :  { %1763 = shalt.err (!%p1760_p1)
}
  0x24   :  { %s1910_s1 = smov 64   ;;  %s1911_s14 = smov 4  }
  0x25   :  { %63 = dma.hbm_to_vmem [thread:$0]  %s2130_s3, 4096, %s58_s28, [#allocation9], %s1910_s1, %s1910_s1, %s1911_s14  }
  0x26   :  { %s1912_s20 = smov [#allocation11]   ;;  %s1913_s22 = smov [#allocation2]  }
  0x27   :  { %s85_s21 = sshll.u32 %s1912_s20, 4  ;;  %s26_s23 = sshll.u32 %s1913_s22, 4  ;;  %s86_s21 = int_to_ptr.vmem [resolvable:$true] %s85_s21  ;;  %s27_s23 = int_to_ptr.vmem [resolvable:$true] %s26_s23 }
  0x28   :  { %s1764_s26 = scalar_lea.hbm %s2134_s7, 1024 }
  0x29   :  { %p1765_p2 = scmp.ne.s32.totalorder %s2134_s7, %s1764_s26  ;;  %p1768_p3 = scmp.lt.u32.totalorder %s1764_s26, %s2134_s7 }
  0x2b   :  { %p1770_p4 = pnand %p1768_p3, %p1765_p2 }
  0x2d   :  { %1773 = shalt.err (!%p1770_p4)
}
  0x2e   :  { %s1774_s3 = scalar_lea.vmem %s86_s21, 1024  ;;  %p1779_p6 = scmp.lt.s32.totalorder %s86_s21, %s86_s21 }
  0x2f   :  { %p1775_p5 = scmp.ne.s32.totalorder %s86_s21, %s1774_s3  ;;  %p1780_p7 = scmp.lt.s32.totalorder %s1774_s3, %s1774_s3 }
  0x31   :  { %p1781_p8 = por %p1780_p7, %p1779_p6 }
  0x33   :  { %p1782_p9 = pnand %p1781_p8, %p1775_p5 }
  0x35   :  { %1785 = shalt.err (!%p1782_p9)
}
  0x36   :  { %91 = dma.hbm_to_vmem [thread:$0]  %s2134_s7, 1024, %s86_s21, [#allocation12], %s1910_s1, %s1910_s1, %s1911_s14  }
  0x37   :  { %s1786_s16 = scalar_lea.hbm %s2127_s0, 64 }
  0x38   :  { %p1787_p10 = scmp.ne.s32.totalorder %s2127_s0, %s1786_s16  ;;  %p1790_p11 = scmp.lt.u32.totalorder %s1786_s16, %s2127_s0 }
  0x3a   :  { %p1792_p12 = pnand %p1790_p11, %p1787_p10 }
  0x3c   :  { %1795 = shalt.err (!%p1792_p12)
}
  0x3d   :  { %s1796_s22 = scalar_lea.vmem %s27_s23, 64  ;;  %p1801_p0 = scmp.lt.s32.totalorder %s27_s23, %s27_s23 }
  0x3e   :  { %p1797_p13 = scmp.ne.s32.totalorder %s27_s23, %s1796_s22  ;;  %p1802_p1 = scmp.lt.s32.totalorder %s1796_s22, %s1796_s22 }
  0x40   :  { %p1803_p2 = por %p1802_p1, %p1801_p0 }
  0x42   :  { %p1804_p3 = pnand %p1803_p2, %p1797_p13 }
  0x44   :  { %1807 = shalt.err (!%p1804_p3)
}
  0x45   :  { %29 = dma.hbm_to_vmem [thread:$0]  %s2127_s0, 64, %s27_s23, [#allocation3]  }
  0x46   :  { %s1914_s24 = smov [#allocation7]   ;;  %s1915_s26 = smov [#allocation10]  }
  0x47   :  { %s48_s25 = sshll.u32 %s1914_s24, 4  ;;  %s71_s27 = sshll.u32 %s1915_s26, 4  ;;  %s49_s25 = int_to_ptr.vmem [resolvable:$true] %s48_s25  ;;  %s2030_s27 = int_to_ptr.vmem [resolvable:$true] %s71_s27 }
  0x48   :  { %s1808_s11 = scalar_lea.hbm %s2129_s2, 128 }
  0x49   :  { %p1809_p4 = scmp.ne.s32.totalorder %s2129_s2, %s1808_s11  ;;  %p1812_p5 = scmp.lt.u32.totalorder %s1808_s11, %s2129_s2 }
  0x4b   :  { %p1814_p6 = pnand %p1812_p5, %p1809_p4 }
  0x4d   :  { %1817 = shalt.err (!%p1814_p6)
}
  0x4e   :  { %s1818_s0 = scalar_lea.vmem %s49_s25, 128  ;;  %p1823_p8 = scmp.lt.s32.totalorder %s49_s25, %s49_s25 }
  0x4f   :  { %p1819_p7 = scmp.ne.s32.totalorder %s49_s25, %s1818_s0  ;;  %p1824_p9 = scmp.lt.s32.totalorder %s1818_s0, %s1818_s0 }
  0x51   :  { %p1825_p10 = por %p1824_p9, %p1823_p8 }
  0x53   :  { %p1826_p11 = pnand %p1825_p10, %p1819_p7 }
  0x55   :  { %1829 = shalt.err (!%p1826_p11)
}
  0x56   :  { %51 = dma.hbm_to_vmem [thread:$0]  %s2129_s2, 128, %s49_s25, [#allocation6]  }
  0x57   :  { %s1830_s18 = scalar_lea.hbm %s2132_s5, 4096 }
  0x58   :  { %p1831_p12 = scmp.ne.s32.totalorder %s2132_s5, %s1830_s18  ;;  %p1834_p13 = scmp.lt.u32.totalorder %s1830_s18, %s2132_s5 }
  0x5a   :  { %p1836_p0 = pnand %p1834_p13, %p1831_p12 }
  0x5c   :  { %1839 = shalt.err (!%p1836_p0)
}
  0x5d   :  { %s1840_s21 = scalar_lea.vmem %s2030_s27, 4096  ;;  %p1845_p2 = scmp.lt.s32.totalorder %s2030_s27, %s2030_s27 }
  0x5e   :  { %p1841_p1 = scmp.ne.s32.totalorder %s2030_s27, %s1840_s21  ;;  %p1846_p3 = scmp.lt.s32.totalorder %s1840_s21, %s1840_s21 }
  0x60   :  { %p1847_p4 = por %p1846_p3, %p1845_p2 }
  0x62   :  { %p1848_p5 = pnand %p1847_p4, %p1841_p1 }
  0x64   :  { %1851 = shalt.err (!%p1848_p5)
}
  0x65   :  { %77 = dma.hbm_to_vmem [thread:$0]  %s2132_s5, 4096, %s2030_s27, [#allocation9], %s1910_s1, %s1910_s1, %s1911_s14  }
  0x66   :  { %s1916_s25 = smov [#allocation13]   ;;  %s1852_s11 = scalar_lea.hbm %s2135_s8, 1024 }
  0x67   :  { %s97_s26 = sshll.u32 %s1916_s25, 4  ;;  %p1853_p6 = scmp.ne.s32.totalorder %s2135_s8, %s1852_s11  ;;  %s98_s26 = int_to_ptr.vmem [resolvable:$true] %s97_s26 }
  0x68   :  { %p1856_p7 = scmp.lt.u32.totalorder %s1852_s11, %s2135_s8 }
  0x6a   :  { %p1858_p8 = pnand %p1856_p7, %p1853_p6 }
  0x6c   :  { %1861 = shalt.err (!%p1858_p8)
}
  0x6d   :  { %s1862_s0 = scalar_lea.vmem %s98_s26, 1024  ;;  %p1867_p10 = scmp.lt.s32.totalorder %s98_s26, %s98_s26 }
  0x6e   :  { %p1863_p9 = scmp.ne.s32.totalorder %s98_s26, %s1862_s0  ;;  %p1868_p11 = scmp.lt.s32.totalorder %s1862_s0, %s1862_s0 }
  0x70   :  { %p1869_p12 = por %p1868_p11, %p1867_p10 }
  0x72   :  { %p1870_p13 = pnand %p1869_p12, %p1863_p9 }
  0x74   :  { %1873 = shalt.err (!%p1870_p13)
}
  0x75   :  { %103 = dma.hbm_to_vmem [thread:$0]  %s2135_s8, 1024, %s98_s26, [#allocation12], %s1910_s1, %s1910_s1, %s1911_s14  }
  0x76   :  { %1896 = dma.done.wait [#allocation3], 64  }
  0x77   :  { %1897 = vsyncadd [#allocation3], 4294967232 }
  0x78   :  { %1898 = dma.done.wait [#allocation6], 2176  }
  0x79   :  { %1899 = vsyncadd [#allocation6], 4294965120 }
  0x7a   :  { %1900 = dma.done.wait [#allocation9], 8192  }
  0x7b   :  { %1901 = vsyncadd [#allocation9], 4294959104 }
  0x7c   :  { %1902 = dma.done.wait [#allocation12], 2048  }
  0x7d   :  { %1903 = vsyncadd [#allocation12], 4294965248  ;;  %v1917_v0 = vmov 0   ;;  %v129_v1 = vld [vmem:[#allocation5] sm:$0xff]  ;;  %v130_v3 = vld [vmem:[#allocation5 + $0x8] sm:$0xff]  ;;  %vm267_vm0 = vcmask 261120  }
  0x7e   :  { %303 = vmatprep.mubr.bf16.mxu0 %v1917_v0  ;;  %344 = vmatprep.mubr.bf16.mxu1 %v1917_v0  ;;  %v133_v2 = vld [vmem:[#allocation5 + $0x20] sm:$0xff]  ;;  %v134_v5 = vld [vmem:[#allocation5 + $0x28] sm:$0xff]  ;;  %v131_v15 = vld [vmem:[#allocation5 + $0x10] sm:$0xff]  ;;  %vm1919_vm1 = vmmov 0   ;;  %s1920_s15 = smov [#allocation14]  }
  0x7f   :  { %v1377_v4 = vcombine.high %v129_v1, %v133_v2  ;;  %v1376_v6 = vcombine.low %v129_v1, %v133_v2  ;;  %v137_v7 = vld [vmem:[#allocation5 + $0x40] sm:$0xff]  ;;  %v1379_v9 = vcombine.high %v130_v3, %v134_v5  ;;  %v1378_v10 = vcombine.low %v130_v3, %v134_v5  ;;  %v138_v12 = vld [vmem:[#allocation5 + $0x48] sm:$0xff]  ;;  %v135_v16 = vld [vmem:[#allocation5 + $0x30] sm:$0xff]  ;;  %s1364_s16 = sshll.u32 %s1920_s15, 4  ;;  %s1365_s16 = int_to_ptr.vmem [resolvable:$true] %s1364_s16 }
  0x80   :  { %v141_v8 = vld [vmem:[#allocation5 + $0x60] sm:$0xff]  ;;  %v142_v13 = vld [vmem:[#allocation5 + $0x68] sm:$0xff]  ;;  %v132_v17 = vld [vmem:[#allocation5 + $0x18] sm:$0xff]  ;;  %v1381_v21 = vcombine.high %v131_v15, %v135_v16  ;;  %v1380_v28 = vcombine.low %v131_v15, %v135_v16  ;;  %s1874_s17 = scalar_lea.vmem %s1365_s16, 128  ;;  %p1879_p1 = scmp.lt.s32.totalorder %s1365_s16, %s1365_s16 }
  0x81   :  { %v1385_v11 = vcombine.high %v137_v7, %v141_v8  ;;  %271 = vmatprep.subr.bf16.mxu0 %v1377_v4  ;;  %v1387_v14 = vcombine.high %v138_v12, %v142_v13  ;;  %312 = vmatprep.subr.bf16.mxu1 %v1379_v9  ;;  %v1384_v18 = vcombine.low %v137_v7, %v141_v8  ;;  %v136_v19 = vld [vmem:[#allocation5 + $0x38] sm:$0xff]  ;;  %v139_v22 = vld [vmem:[#allocation5 + $0x50] sm:$0xff]  ;;  %v1640_v34 = vld [vmem:[#allocation8 + $0x40] sm:$0xff]   ;;  %v147_v4 = vlaneseq  ;;  %p1875_p0 = scmp.ne.s32.totalorder %s1365_s16, %s1874_s17  ;;  %p1880_p2 = scmp.lt.s32.totalorder %s1874_s17, %s1874_s17 }
  0x82   :  { %272 = vmatpush1.bf16.msra.mxu0 %v1376_v6  ;;  %313 = vmatpush1.bf16.msra.mxu1 %v1378_v10  ;;  %v1386_v20 = vcombine.low %v138_v12, %v142_v13  ;;  %v143_v23 = vld [vmem:[#allocation5 + $0x70] sm:$0xff]  ;;  %v1383_v24 = vcombine.high %v132_v17, %v136_v19  ;;  %v140_v25 = vld [vmem:[#allocation5 + $0x58] sm:$0xff]  ;;  %v1382_v29 = vcombine.low %v132_v17, %v136_v19  ;;  %v1641_v35 = vld [vmem:[#allocation8 + $0xc0] sm:$0xff]  }
  0x83   :  { %273 = vmatprep.subr.bf16.mxu0 %v1385_v11  ;;  %314 = vmatprep.subr.bf16.mxu1 %v1387_v14  ;;  %v144_v26 = vld [vmem:[#allocation5 + $0x78] sm:$0xff]  ;;  %v1389_v30 = vcombine.high %v139_v22, %v143_v23  ;;  %v1388_v32 = vcombine.low %v139_v22, %v143_v23  ;;  %v1642_v36 = vld [vmem:[#allocation8] sm:$0xff]   ;;  %v1644_v38 = vld [vmem:[#allocation8 + $0x48] sm:$0xff]   ;;  %v2083_v5 = vshrl.u32 %v147_v4, 7  ;;  %p1881_p3 = por %p1880_p2, %p1879_p1 }
  0x84   :  { %v128_v27 = vld [vmem:[#allocation2] sm:$0xf]  ;;  %v1391_v31 = vcombine.high %v140_v25, %v144_v26  ;;  %v1390_v33 = vcombine.low %v140_v25, %v144_v26  ;;  %v1643_v37 = vld [vmem:[#allocation8 + $0x80] sm:$0xff]   ;;  %v1645_v39 = vld [vmem:[#allocation8 + $0xc8] sm:$0xff]  }
  0x85   :  { %v1646_v40 = vld [vmem:[#allocation8 + $0x8] sm:$0xff]   ;;  %v1648_v42 = vld [vmem:[#allocation8 + $0x50] sm:$0xff]   ;;  %v1652_v46 = vld [vmem:[#allocation8 + $0x58] sm:$0xff]   ;;  %v149_v6 = vsub.s32 0, %v2083_v5  ;;  %v157_v8 = vsub.s32 2, %v2083_v5  ;;  %v153_v9 = vsub.s32 1, %v2083_v5  ;;  %p1882_p4 = pnand %p1881_p3, %p1875_p0 }
  0x86   :  { %274 = vmatpush1.bf16.msra.mxu0 %v1384_v18  ;;  %315 = vmatpush1.bf16.msra.mxu1 %v1386_v20  ;;  %v1647_v41 = vld [vmem:[#allocation8 + $0x88] sm:$0xff]   ;;  %v1649_v43 = vld [vmem:[#allocation8 + $0xd0] sm:$0xff]   ;;  %v1653_v47 = vld [vmem:[#allocation8 + $0xd8] sm:$0xff]   ;;  %v161_v10 = vsub.s32 3, %v2083_v5  ;;  %v169_v23 = vsub.s32 5, %v2083_v5 }
  0x87   :  { %353 = vmatprep.subr.bf16.mxu0 %v1381_v21  ;;  %394 = vmatprep.subr.bf16.mxu1 %v1383_v24  ;;  %v1650_v44 = vld [vmem:[#allocation8 + $0x10] sm:$0xff]   ;;  %v1654_v48 = vld [vmem:[#allocation8 + $0x18] sm:$0xff]   ;;  %v1656_v50 = vld [vmem:[#allocation8 + $0x60] sm:$0xff]  }
  0x88   :  { %v1651_v45 = vld [vmem:[#allocation8 + $0x90] sm:$0xff]   ;;  %v1655_v49 = vld [vmem:[#allocation8 + $0x98] sm:$0xff]   ;;  %v1657_v51 = vld [vmem:[#allocation8 + $0xe0] sm:$0xff]  }
  0x89   :  { %1392 = vmatmul.mubr.msk.bf16.vlgmr.msra.gmra.mrb[0].mxu0 %vm267_vm0, %v128_v27  ;;  %1393 = vmatmul.mubr.msk.bf16.vlgmr.msra.gmra.mrb[0].mxu1 %vm267_vm0, %v128_v27  ;;  %v1658_v52 = vld [vmem:[#allocation8 + $0x20] sm:$0xff]   ;;  %v1660_v54 = vld [vmem:[#allocation8 + $0x68] sm:$0xff]   ;;  %v1664_v58 = vld [vmem:[#allocation8 + $0x70] sm:$0xff]  }
  0x8a   :  { %354 = vmatpush1.bf16.msra.mxu0 %v1380_v28  ;;  %395 = vmatpush1.bf16.msra.mxu1 %v1382_v29  ;;  %v1659_v53 = vld [vmem:[#allocation8 + $0xa0] sm:$0xff]   ;;  %v1661_v55 = vld [vmem:[#allocation8 + $0xe8] sm:$0xff]   ;;  %v1665_v59 = vld [vmem:[#allocation8 + $0xf0] sm:$0xff]   ;;  %v177_v28 = vsub.s32 7, %v2083_v5 }
  0x8b   :  { %355 = vmatprep.subr.bf16.mxu0 %v1389_v30  ;;  %396 = vmatprep.subr.bf16.mxu1 %v1391_v31  ;;  %v1662_v56 = vld [vmem:[#allocation8 + $0x28] sm:$0xff]   ;;  %v1666_v60 = vld [vmem:[#allocation8 + $0x30] sm:$0xff]   ;;  %v1668_v62 = vld [vmem:[#allocation8 + $0x78] sm:$0xff]  }
  0x8c   :  { %385 = vmatprep.mubr.bf16.mxu0 %v1917_v0  ;;  %426 = vmatprep.mubr.bf16.mxu1 %v1917_v0  ;;  %v1663_v57 = vld [vmem:[#allocation8 + $0xa8] sm:$0xff]   ;;  %v1667_v61 = vld [vmem:[#allocation8 + $0xb0] sm:$0xff]   ;;  %v1669_v63 = vld [vmem:[#allocation8 + $0xf8] sm:$0xff]  }
  0x8d   :  { %v1670_v0 = vld [vmem:[#allocation8 + $0x38] sm:$0xff]   ;;  %v1672_v2 = vld [vmem:[#allocation10 + $0x40] sm:$0xff]  }
  0x8e   :  { %356 = vmatpush1.bf16.msra.mxu0 %v1388_v32  ;;  %397 = vmatpush1.bf16.msra.mxu1 %v1390_v33  ;;  %v1671_v1 = vld [vmem:[#allocation8 + $0xb8] sm:$0xff]   ;;  %v1673_v3 = vld [vmem:[#allocation10 + $0xc0] sm:$0xff]  }
  0x8f   :  { %1479 = vmatprep.subr.bf16.mxu0 %v1640_v34  ;;  %1501 = vmatprep.subr.bf16.mxu1 %v1641_v35  ;;  %v2086_v7 = vld [vmem:[#allocation7] sm:$0xff]  ;;  %v1674_v35 = vld [vmem:[#allocation10] sm:$0xff]  }
  0x90   :  { %v150_v11 = vrot.slane %v2086_v7, %v149_v6  ;;  %v158_v12 = vrot.slane %v2086_v7, %v157_v8  ;;  %v154_v13 = vrot.slane %v2086_v7, %v153_v9  ;;  %v162_v14 = vrot.slane %v2086_v7, %v161_v10  ;;  %v1689_v4 = vld [vmem:[#allocation10 + $0xe0] sm:$0xff]  }
  0x91   :  { %1394 = vmatmul.mubr.msk.bf16.vlgmr.msra.gmra.mrb[4].mxu0 %vm267_vm0, %v128_v27  ;;  %1395 = vmatmul.mubr.msk.bf16.vlgmr.msra.gmra.mrb[4].mxu1 %vm267_vm0, %v128_v27  ;;  %v1690_v6 = vld [vmem:[#allocation10 + $0x20] sm:$0xff]   ;;  %v173_v8 = vsub.s32 6, %v2083_v5  ;;  %v165_v10 = vsub.s32 4, %v2083_v5 }
  0x92   :  { %1480 = vmatpush3.bf16.msra.mxu0 %v1642_v36  ;;  %1502 = vmatpush3.bf16.msra.mxu1 %v1643_v37  ;;  %v170_v36 = vrot.slane %v2086_v7, %v169_v23  ;;  %v1691_v9 = vld [vmem:[#allocation10 + $0xa0] sm:$0xff]   ;;  %v1701_v23 = vld [vmem:[#allocation10 + $0xf8] sm:$0xff]  }
  0x93   :  { %1481 = vmatprep.subr.bf16.mxu0 %v1644_v38  ;;  %1503 = vmatprep.subr.bf16.mxu1 %v1645_v39  ;;  %v1675_v39 = vld [vmem:[#allocation10 + $0x80] sm:$0xff]  }
  0x96   :  { %1482 = vmatpush3.bf16.msra.mxu0 %v1646_v40  ;;  %1504 = vmatpush3.bf16.msra.mxu1 %v1647_v41  ;;  %v1676_v40 = vld [vmem:[#allocation10 + $0x48] sm:$0xff]   ;;  %v178_v41 = vrot.slane %v2086_v7, %v177_v28 }
  0x97   :  { %1483 = vmatprep.subr.bf16.mxu0 %v1648_v42  ;;  %1505 = vmatprep.subr.bf16.mxu1 %v1649_v43  ;;  %v1677_v42 = vld [vmem:[#allocation10 + $0xc8] sm:$0xff]  }
  0x9a   :  { %1484 = vmatpush3.bf16.msra.mxu0 %v1650_v44  ;;  %1506 = vmatpush3.bf16.msra.mxu1 %v1651_v45 }
  0x9b   :  { %1485 = vmatprep.subr.bf16.mxu0 %v1652_v46  ;;  %1507 = vmatprep.subr.bf16.mxu1 %v1653_v47  ;;  %v1678_v46 = vld [vmem:[#allocation10 + $0x8] sm:$0xff]  }
  0x9e   :  { %1486 = vmatpush3.bf16.msra.mxu0 %v1654_v48  ;;  %1508 = vmatpush3.bf16.msra.mxu1 %v1655_v49 }
  0x9f   :  { %1487 = vmatprep.subr.bf16.mxu0 %v1656_v50  ;;  %1509 = vmatprep.subr.bf16.mxu1 %v1657_v51  ;;  %v1679_v50 = vld [vmem:[#allocation10 + $0x88] sm:$0xff]   ;;  %v1680_v51 = vld [vmem:[#allocation10 + $0x50] sm:$0xff]  }
  0xa2   :  { %1488 = vmatpush3.bf16.msra.mxu0 %v1658_v52  ;;  %1510 = vmatpush3.bf16.msra.mxu1 %v1659_v53 }
  0xa3   :  { %1489 = vmatprep.subr.bf16.mxu0 %v1660_v54  ;;  %1511 = vmatprep.subr.bf16.mxu1 %v1661_v55  ;;  %v1681_v55 = vld [vmem:[#allocation10 + $0xd0] sm:$0xff]  }
  0xa6   :  { %1490 = vmatpush3.bf16.msra.mxu0 %v1662_v56  ;;  %1512 = vmatpush3.bf16.msra.mxu1 %v1663_v57 }
  0xa7   :  { %1491 = vmatprep.subr.bf16.mxu0 %v1664_v58  ;;  %1513 = vmatprep.subr.bf16.mxu1 %v1665_v59  ;;  %v1682_v59 = vld [vmem:[#allocation10 + $0x10] sm:$0xff]  }
  0xaa   :  { %1492 = vmatpush3.bf16.msra.mxu0 %v1666_v60  ;;  %1514 = vmatpush3.bf16.msra.mxu1 %v1667_v61  ;;  %v1683_v61 = vld [vmem:[#allocation10 + $0x90] sm:$0xff]  }
  0xab   :  { %1493 = vmatprep.subr.bf16.mxu0 %v1668_v62  ;;  %1515 = vmatprep.subr.bf16.mxu1 %v1669_v63  ;;  %v1684_v62 = vld [vmem:[#allocation10 + $0x58] sm:$0xff]  }
  0xae   :  { %1494 = vmatpush3.bf16.msra.mxu0 %v1670_v0  ;;  %1516 = vmatpush3.bf16.msra.mxu1 %v1671_v1  ;;  %v1685_v0 = vld [vmem:[#allocation10 + $0xd8] sm:$0xff]  }
  0xaf   :  { %1523 = vmatprep.subr.bf16.mxu0 %v1672_v2  ;;  %1545 = vmatprep.subr.bf16.mxu1 %v1673_v3  ;;  %v1686_v1 = vld [vmem:[#allocation10 + $0x18] sm:$0xff]   ;;  %v1688_v3 = vld [vmem:[#allocation10 + $0x60] sm:$0xff]  }
  0xb0   :  { %v1687_v2 = vld [vmem:[#allocation10 + $0x98] sm:$0xff]  }
 0x15c   :  { %v305_v15 = vpop.f32.mrb[0].mxu0  ;;  %v346_v17 = vpop.f32.mrb[0].mxu1 }
 0x15d   :  { %v306_v16 = vadd.f32 %v305_v15, %v150_v11  ;;  %v307_v18 = vpop.f32.mrb[1].mxu0  ;;  %v347_v19 = vadd.f32 %v346_v17, %v158_v12  ;;  %v348_v21 = vpop.f32.mrb[1].mxu1  ;;  %v1692_v11 = vld [vmem:[#allocation10 + $0x68] sm:$0xff]   ;;  %v166_v15 = vrot.slane %v2086_v7, %v165_v10  ;;  %v1696_v17 = vld [vmem:[#allocation10 + $0x70] sm:$0xff]  }
 0x15e   :  { %v308_v20 = vadd.f32 %v307_v18, %v154_v13  ;;  %v309_v22 = vpop.f32.mrb[2].mxu0  ;;  %v349_v25 = vadd.f32 %v348_v21, %v162_v14  ;;  %v350_v26 = vpop.f32.mrb[2].mxu1  ;;  %v1693_v12 = vld [vmem:[#allocation10 + $0xe8] sm:$0xff]   ;;  %v174_v14 = vrot.slane %v2086_v7, %v173_v8  ;;  %v1697_v18 = vld [vmem:[#allocation10 + $0xf0] sm:$0xff]  }
 0x15f   :  { %v435_v24 = vmax.f32 %v306_v16, 0.0  ;;  %v310_v27 = vpop.f32.mrb[3].mxu0  ;;  %v437_v29 = vmax.f32 %v347_v19, 0.0  ;;  %v351_v31 = vpop.f32.mrb[3].mxu1  ;;  %v1694_v13 = vld [vmem:[#allocation10 + $0x28] sm:$0xff]   ;;  %v1699_v21 = vld [vmem:[#allocation10 + $0xb0] sm:$0xff]  }
 0x160   :  { %v436_v30 = vmax.f32 %v308_v20, 0.0  ;;  %v438_v32 = vmax.f32 %v349_v25, 0.0  ;;  %v1695_v16 = vld [vmem:[#allocation10 + $0xa8] sm:$0xff]   ;;  %v1698_v20 = vld [vmem:[#allocation10 + $0x30] sm:$0xff]   ;;  %v1700_v22 = vld [vmem:[#allocation10 + $0x78] sm:$0xff]  }
 0x161   :  { %v445_v33 = vpack.c.bf16 %v437_v29, %v437_v29  ;;  %v443_v37 = vpack.c.bf16 %v435_v24, %v435_v24  ;;  %v1702_v25 = vld [vmem:[#allocation10 + $0x38] sm:$0xff]   ;;  %v1704_v29 = vld [vmem:[#allocation11] sm:$0xff]   ;;  %v1705_v31 = vld [vmem:[#allocation11 + $0x8] sm:$0xff]  }
 0x162   :  { %v444_v34 = vpack.c.bf16 %v436_v30, %v436_v30  ;;  %v446_v38 = vpack.c.bf16 %v438_v32, %v438_v32  ;;  %v1703_v26 = vld [vmem:[#allocation10 + $0xb8] sm:$0xff]   ;;  %v1918_v30 = vmov 0.0   ;;  %v1706_v32 = vld [vmem:[#allocation11 + $0x10] sm:$0xff]  }
 0x164   :  { %746 = vmatprep.mubr.bf16.mxu0 %v444_v34  ;;  %v2099_v43 = vpop.f32.mrb[4].mxu0  ;;  %786 = vmatprep.mubr.bf16.mxu1 %v446_v38  ;;  %v428_v45 = vpop.f32.mrb[4].mxu1  ;;  %v1708_v34 = vld [vmem:[#allocation11 + $0x20] sm:$0xff]  }
 0x165   :  { %747 = vmatmul.mubr.bf16.vlgmr.msra.gmra.mrb[8].mxu0 %v443_v37  ;;  %v389_v44 = vpop.f32.mrb[5].mxu0  ;;  %787 = vmatmul.mubr.bf16.vlgmr.msra.gmra.mrb[8].mxu1 %v445_v33  ;;  %v430_v49 = vpop.f32.mrb[5].mxu1  ;;  %v429_v19 = vadd.f32 %v428_v45, %v174_v14  ;;  %v388_v5 = vadd.f32 %v2099_v43, %v166_v15  ;;  %v1707_v33 = vld [vmem:[#allocation11 + $0x18] sm:$0xff]   ;;  %v1712_v38 = vld [vmem:[#allocation13] sm:$0xff]   ;;  %v1717_v43 = vld [vmem:[#allocation13 + $0x28] sm:$0xff]  }
 0x166   :  { %1524 = vmatpush3.bf16.msra.mxu0 %v1674_v35  ;;  %v390_v47 = vadd.f32 %v389_v44, %v170_v36  ;;  %v391_v48 = vpop.f32.mrb[6].mxu0  ;;  %1546 = vmatpush3.bf16.msra.mxu1 %v1675_v39  ;;  %v431_v53 = vadd.f32 %v430_v49, %v178_v41  ;;  %v432_v54 = vpop.f32.mrb[6].mxu1  ;;  %v1709_v35 = vld [vmem:[#allocation11 + $0x28] sm:$0xff]   ;;  %v1710_v36 = vld [vmem:[#allocation11 + $0x30] sm:$0xff]   ;;  %v1711_v37 = vld [vmem:[#allocation11 + $0x38] sm:$0xff]  }
 0x167   :  { %1525 = vmatprep.subr.bf16.mxu0 %v1676_v40  ;;  %v392_v52 = vpop.f32.mrb[7].mxu0  ;;  %1547 = vmatprep.subr.bf16.mxu1 %v1677_v42  ;;  %v433_v57 = vpop.f32.mrb[7].mxu1  ;;  %v441_v24 = vmax.f32 %v429_v19, 0.0  ;;  %v439_v7 = vmax.f32 %v388_v5, 0.0  ;;  %v1713_v39 = vld [vmem:[#allocation13 + $0x8] sm:$0xff]   ;;  %v1714_v40 = vld [vmem:[#allocation13 + $0x10] sm:$0xff]  }
 0x168   :  { %v440_v56 = vmax.f32 %v390_v47, 0.0  ;;  %v442_v58 = vmax.f32 %v431_v53, 0.0  ;;  %v1715_v41 = vld [vmem:[#allocation13 + $0x18] sm:$0xff]   ;;  %v1716_v42 = vld [vmem:[#allocation13 + $0x20] sm:$0xff]   ;;  %v1718_v44 = vld [vmem:[#allocation13 + $0x30] sm:$0xff]  }
 0x169   :  { %v449_v27 = vpack.c.bf16 %v441_v24, %v441_v24  ;;  %v447_v28 = vpack.c.bf16 %v439_v7, %v439_v7  ;;  %v1719_v45 = vld [vmem:[#allocation13 + $0x38] sm:$0xff]   ;;  %v1396_v48 = vld [vmem:[%s2131_s4] ss:$0 sm:$0xff] }
 0x16a   :  { %1526 = vmatpush3.bf16.msra.mxu0 %v1678_v46  ;;  %v448_v60 = vpack.c.bf16 %v440_v56, %v440_v56  ;;  %1548 = vmatpush3.bf16.msra.mxu1 %v1679_v50  ;;  %v450_v63 = vpack.c.bf16 %v442_v58, %v442_v58  ;;  %v1478_v19 = vld [vmem:[%s2136_s9] ss:$0 sm:$0xff] }
 0x16b   :  { %1527 = vmatprep.subr.bf16.mxu0 %v1680_v51  ;;  %1549 = vmatprep.subr.bf16.mxu1 %v1681_v55 }
 0x16c   :  { %1091 = vmatprep.mubr.bf16.mxu0 %v448_v60  ;;  %1131 = vmatprep.mubr.bf16.mxu1 %v450_v63  ;;  %v1429_v63 = vld [vmem:[%s2133_s6] ss:$0 sm:$0xff] }
 0x16e   :  { %1528 = vmatpush3.bf16.msra.mxu0 %v1682_v59  ;;  %1550 = vmatpush3.bf16.msra.mxu1 %v1683_v61 }
 0x16f   :  { %1529 = vmatprep.subr.bf16.mxu0 %v1684_v62  ;;  %1551 = vmatprep.subr.bf16.mxu1 %v1685_v0 }
 0x172   :  { %1530 = vmatpush3.bf16.msra.mxu0 %v1686_v1  ;;  %1552 = vmatpush3.bf16.msra.mxu1 %v1687_v2 }
 0x173   :  { %1531 = vmatprep.subr.bf16.mxu0 %v1688_v3  ;;  %1553 = vmatprep.subr.bf16.mxu1 %v1689_v4 }
 0x176   :  { %1532 = vmatpush3.bf16.msra.mxu0 %v1690_v6  ;;  %1554 = vmatpush3.bf16.msra.mxu1 %v1691_v9 }
 0x177   :  { %1533 = vmatprep.subr.bf16.mxu0 %v1692_v11  ;;  %1555 = vmatprep.subr.bf16.mxu1 %v1693_v12 }
 0x17a   :  { %1534 = vmatpush3.bf16.msra.mxu0 %v1694_v13  ;;  %1556 = vmatpush3.bf16.msra.mxu1 %v1695_v16 }
 0x17b   :  { %1535 = vmatprep.subr.bf16.mxu0 %v1696_v17  ;;  %1557 = vmatprep.subr.bf16.mxu1 %v1697_v18 }
 0x17e   :  { %1536 = vmatpush3.bf16.msra.mxu0 %v1698_v20  ;;  %1558 = vmatpush3.bf16.msra.mxu1 %v1699_v21 }
 0x17f   :  { %1537 = vmatprep.subr.bf16.mxu0 %v1700_v22  ;;  %1559 = vmatprep.subr.bf16.mxu1 %v1701_v23 }
 0x182   :  { %1538 = vmatpush3.bf16.msra.mxu0 %v1702_v25  ;;  %1560 = vmatpush3.bf16.msra.mxu1 %v1703_v26 }
 0x183   :  { %1585 = vmatprep.subr.bf16.mxu0 %v1918_v30  ;;  %1605 = vmatprep.subr.bf16.mxu1 %v1918_v30 }
 0x185   :  { %1092 = vmatmul.mubr.bf16.vlgmr.msra.gmra.mrb[12].mxu0 %v447_v28  ;;  %1132 = vmatmul.mubr.bf16.vlgmr.msra.gmra.mrb[12].mxu1 %v449_v27 }
 0x186   :  { %1606 = vmatpush3.bf16.msra.mxu1 %v1704_v29  ;;  %1621 = vmatprep.mubr.msk.bf16.mxu1 %vm1919_vm1, %v1918_v30 }
 0x187   :  { %1607 = vmatprep.subr.bf16.mxu1 %v1918_v30  ;;  %1586 = vmatpush3.bf16.msra.mxu0 %v1712_v38 }
 0x188   :  { %1601 = vmatprep.mubr.msk.bf16.mxu0 %vm1919_vm1, %v1918_v30  ;;  %1587 = vmatprep.subr.bf16.mxu0 %v1918_v30 }
 0x18a   :  { %1608 = vmatpush3.bf16.msra.mxu1 %v1705_v31 }
 0x18b   :  { %1609 = vmatprep.subr.bf16.mxu1 %v1918_v30  ;;  %1588 = vmatpush3.bf16.msra.mxu0 %v1713_v39 }
 0x18c   :  { %1589 = vmatprep.subr.bf16.mxu0 %v1918_v30 }
 0x18e   :  { %1610 = vmatpush3.bf16.msra.mxu1 %v1706_v32 }
 0x18f   :  { %1611 = vmatprep.subr.bf16.mxu1 %v1918_v30  ;;  %1590 = vmatpush3.bf16.msra.mxu0 %v1714_v40 }
 0x190   :  { %1591 = vmatprep.subr.bf16.mxu0 %v1918_v30 }
 0x192   :  { %1612 = vmatpush3.bf16.msra.mxu1 %v1707_v33 }
 0x193   :  { %1613 = vmatprep.subr.bf16.mxu1 %v1918_v30  ;;  %1592 = vmatpush3.bf16.msra.mxu0 %v1715_v41 }
 0x194   :  { %1593 = vmatprep.subr.bf16.mxu0 %v1918_v30 }
 0x196   :  { %1614 = vmatpush3.bf16.msra.mxu1 %v1708_v34 }
 0x197   :  { %1615 = vmatprep.subr.bf16.mxu1 %v1918_v30  ;;  %1594 = vmatpush3.bf16.msra.mxu0 %v1716_v42 }
 0x198   :  { %1595 = vmatprep.subr.bf16.mxu0 %v1918_v30 }
 0x19a   :  { %1616 = vmatpush3.bf16.msra.mxu1 %v1709_v35 }
 0x19b   :  { %1617 = vmatprep.subr.bf16.mxu1 %v1918_v30  ;;  %1596 = vmatpush3.bf16.msra.mxu0 %v1717_v43 }
 0x19c   :  { %1597 = vmatprep.subr.bf16.mxu0 %v1918_v30 }
 0x19e   :  { %1618 = vmatpush3.bf16.msra.mxu1 %v1710_v36 }
 0x19f   :  { %1619 = vmatprep.subr.bf16.mxu1 %v1918_v30  ;;  %1598 = vmatpush3.bf16.msra.mxu0 %v1718_v44 }
 0x1a0   :  { %1599 = vmatprep.subr.bf16.mxu0 %v1918_v30 }
 0x1a2   :  { %1620 = vmatpush3.bf16.msra.mxu1 %v1711_v37 }
 0x1a3   :  { %1600 = vmatpush3.bf16.msra.mxu0 %v1719_v45 }
 0x238   :  { %v1495_v46 = vpop.f32.mrb[8].mxu0  ;;  %v1517_v47 = vpop.f32.mrb[8].mxu1 }
 0x239   :  { %v1496_v49 = vpop.f32.mrb[9].mxu0  ;;  %v1518_v51 = vpop.f32.mrb[9].mxu1 }
 0x23a   :  { %v1497_v50 = vadd.f32 %v1496_v49, %v1495_v46  ;;  %v1498_v52 = vpop.f32.mrb[10].mxu0  ;;  %v1519_v53 = vadd.f32 %v1518_v51, %v1517_v47  ;;  %v1520_v54 = vpop.f32.mrb[10].mxu1 }
 0x23b   :  { %v1499_v55 = vpop.f32.mrb[11].mxu0  ;;  %v1521_v57 = vpop.f32.mrb[11].mxu1 }
 0x23c   :  { %v749_v56 = vadd.f32 %v1497_v50, %v1396_v48 }
 0x23e   :  { %v789_v58 = vadd.f32 %v1519_v53, %v749_v56 }
 0x240   :  { %v794_v59 = vmax.f32 %v789_v58, 0.0 }
 0x242   :  { %v795_v60 = vpack.c.bf16 %v794_v59, %v794_v59 }
 0x244   :  { %1622 = vmatmul.mubr.bf16.vlgmr.msra.gmra.mrb[16].mxu1 %v795_v60 }
 0x258   :  { %v1539_v61 = vpop.f32.mrb[12].mxu0  ;;  %v1561_v62 = vpop.f32.mrb[12].mxu1 }
 0x259   :  { %v1540_v0 = vpop.f32.mrb[13].mxu0  ;;  %v1562_v2 = vpop.f32.mrb[13].mxu1 }
 0x25a   :  { %v1541_v1 = vadd.f32 %v1540_v0, %v1539_v61  ;;  %v1542_v3 = vpop.f32.mrb[14].mxu0  ;;  %v1563_v4 = vadd.f32 %v1562_v2, %v1561_v62  ;;  %v1564_v6 = vpop.f32.mrb[14].mxu1 }
 0x25b   :  { %v1543_v8 = vpop.f32.mrb[15].mxu0  ;;  %v1565_v10 = vpop.f32.mrb[15].mxu1 }
 0x25c   :  { %v1094_v9 = vadd.f32 %v1541_v1, %v1429_v63 }
 0x25e   :  { %v1134_v11 = vadd.f32 %v1563_v4, %v1094_v9 }
 0x260   :  { %v1139_v12 = vmax.f32 %v1134_v11, 0.0 }
 0x262   :  { %v1140_v13 = vpack.c.bf16 %v1139_v12, %v1139_v12 }
 0x264   :  { %1602 = vmatmul.mubr.bf16.vlgmr.msra.gmra.mrb[16].mxu0 %v1140_v13 }
 0x317   :  { %v1343_v14 = vpop.f32.mrb[16].mxu1 }
 0x318   :  { %v1623_v15 = vpop.f32.mrb[17].mxu1 }
 0x319   :  { %v1346_v16 = vpop.f32.mrb[18].mxu1 }
 0x31a   :  { %v1624_v17 = vpop.f32.mrb[19].mxu1 }
 0x337   :  { %v1255_v18 = vpop.f32.mrb[16].mxu0 }
 0x338   :  { %v1344_v20 = vadd.f32 %v1343_v14, %v1255_v18  ;;  %v1603_v5 = vpop.f32.mrb[17].mxu0 }
 0x339   :  { %v1258_v21 = vpop.f32.mrb[18].mxu0 }
 0x33a   :  { %v1356_v22 = vadd.f32 %v1478_v19, %v1344_v20  ;;  %v1604_v23 = vpop.f32.mrb[19].mxu0 }
 0x33c   :  { %1357 = vst [vmem:[#allocation14] sm:$0xff] %v1356_v22 }
 0x33d   :  { %1885 = shalt.err (!%p1882_p4)
}
 0x33e   :  { %s1886_s9 = scalar_lea.hbm %s2137_s10, 128 }
 0x33f   :  { %p1887_p5 = scmp.ne.s32.totalorder %s2137_s10, %s1886_s9  ;;  %p1890_p6 = scmp.lt.u32.totalorder %s1886_s9, %s2137_s10 }
 0x341   :  { %p1892_p7 = pnand %p1890_p6, %p1887_p5 }
 0x343   :  { %1895 = shalt.err (!%p1892_p7)
}
 0x344   :  { %1367 = dma.vmem_to_hbm [thread:$0]  %s1365_s16, 128, %s2137_s10, [#allocation4]  }
 0x345   :  { %1904 = dma.done.wait [#allocation4], 128  }
 0x346   :  { %1905 = vsyncadd [#allocation4], 4294967168 }
 0x347   :  { %1371 = vsyncpa [#allocation3], 1 }
 0x348   :  { %1372 = vsyncpa [#allocation6], 1 }
 0x349   :  { %1373 = vsyncpa [#allocation9], 1 }
 0x34a   :  { %1374 = vsyncpa [#allocation12], 1 }
 0x34b   :  { %1375 = vsyncpa [#allocation4], 1 }

</bundles_post_ra>
